<compile_context>
chip_gen: v7x
topology: tpu7x:2x2x1
jax: 0.10.0
libtpu: 0.0.40
codegen_flags: <defaults>
</compile_context>

<pallas_src>
import jax
import jax.numpy as jnp
from jax.experimental import pallas as pl
from jax.experimental.pallas import tpu as pltpu

# VMEM planning constants (v7x has 64 MiB VMEM per TensorCore; v5e/v6e have 128 MiB).
_VMEM_BUDGET_BYTES = 40 * 1024 * 1024   # working-set cap used for tk / path selection
_VMEM_LIMIT_BYTES = 48 * 1024 * 1024    # scoped-VMEM limit handed to Mosaic


def _round_up(x, m):
    return ((x + m - 1) // m) * m


def _largest_divisor_tile(fp, cap):
    """Largest multiple of 128 that divides `fp` (itself a multiple of 128) and is <= cap."""
    m = fp // 128
    best = 1
    for d in range(1, m + 1):
        if m % d == 0 and 128 * d <= cap:
            best = d
    return 128 * best


def _silu(x):
    # x * sigmoid(x); sigmoid via tanh (EUP slot, numerically stable for large |x|).
    return x * (0.5 * (jnp.tanh(0.5 * x) + 1.0))


def _mlp_head(h, w1_ref, b1_ref, w2_ref, b2_ref, w3_ref, b3_ref, wa_ref, ba_ref):
    """(Linear -> Dropout(identity) -> SiLU) x3 -> action-mean Linear, all VMEM-resident."""
    h = _silu(jnp.dot(h.astype(jnp.bfloat16), w1_ref[...],
                      preferred_element_type=jnp.float32) + b1_ref[...])
    h = _silu(jnp.dot(h.astype(jnp.bfloat16), w2_ref[...],
                      preferred_element_type=jnp.float32) + b2_ref[...])
    h = _silu(jnp.dot(h.astype(jnp.bfloat16), w3_ref[...],
                      preferred_element_type=jnp.float32) + b3_ref[...])
    return jnp.dot(h.astype(jnp.bfloat16), wa_ref[...],
                   preferred_element_type=jnp.float32) + ba_ref[...]


def gcbc_kernel_single(xo_ref, xg_ref, weo_ref, weg_ref, be_ref,
                       w1_ref, b1_ref, w2_ref, b2_ref, w3_ref, b3_ref,
                       wa_ref, ba_ref, out_ref):
    # Whole encoder reduction in one shot (weights fit VMEM): no accumulator, no pl.when.
    h = _silu(jnp.dot(xo_ref[...], weo_ref[...], preferred_element_type=jnp.float32)
              + jnp.dot(xg_ref[...], weg_ref[...], preferred_element_type=jnp.float32)
              + be_ref[...])
    out_ref[...] = _mlp_head(h, w1_ref, b1_ref, w2_ref, b2_ref,
                             w3_ref, b3_ref, wa_ref, ba_ref)


def gcbc_kernel_tiled(xo_ref, xg_ref, weo_ref, weg_ref, be_ref,
                      w1_ref, b1_ref, w2_ref, b2_ref, w3_ref, b3_ref,
                      wa_ref, ba_ref, out_ref, acc_ref):
    k = pl.program_id(1)

    @pl.when(k == 0)
    def _():
        acc_ref[...] = jnp.zeros_like(acc_ref)

    # Encoder matmul chunk; obs/goal channel-concat fused as two dots
    # (bf16 MXU operands straight from HBM, f32 accumulation in VMEM scratch).
    acc_ref[...] += (
        jnp.dot(xo_ref[...], weo_ref[...], preferred_element_type=jnp.float32)
        + jnp.dot(xg_ref[...], weg_ref[...], preferred_element_type=jnp.float32))

    @pl.when(k == pl.num_programs(1) - 1)
    def _():
        h = _silu(acc_ref[...] + be_ref[...])
        out_ref[...] = _mlp_head(h, w1_ref, b1_ref, w2_ref, b2_ref,
                                 w3_ref, b3_ref, wa_ref, ba_ref)


def _plan_tiling(B, Fp, E, H, A_pad, *, vmem_budget_bytes, max_tk, force_tiled):
    """Pick (mode, bt, B_pad, nb, tk, nk) against a v7x-safe VMEM working-set budget."""
    B8 = _round_up(max(B, 1), 8)
    # >=128 rows for full MXU occupancy on large batches; capped at 128 so B>=256 yields
    # nb>=2 tiles on the parallel axis (v7x: 2 TensorCores).
    bt = min(B8, 128)
    B_pad = _round_up(B8, bt)
    nb = B_pad // bt

    # Conservative accounting: assume every stream is double-buffered.
    mlp_bytes = 2 * ((E * H + 2 * H * H + H * A_pad) * 2      # bf16 MLP/head weights
                     + (E + 3 * H + A_pad) * 4)                # f32 biases
    out_bytes = 2 * bt * A_pad * 4
    fixed = mlp_bytes + out_bytes

    single_bytes = fixed + 2 * (2 * bt * Fp + 2 * Fp * E) * 2  # bf16 inputs + enc weights
    if single_bytes <= vmem_budget_bytes and not force_tiled:
        return "single", bt, B_pad, nb, Fp, 1

    acc_bytes = bt * E * 4
    per_tk = 2 * (2 * bt + 2 * E) * 2       # per unit of tk: 2 inputs + 2 weight streams
    tk_cap = max(128, (vmem_budget_bytes - fixed - acc_bytes) // per_tk)
    tk_cap = min(tk_cap, max_tk, Fp)
    tk = _largest_divisor_tile(Fp, tk_cap)
    return "tiled", bt, B_pad, nb, tk, Fp // tk


def gcbc_forward_pallas(obs_flat, goal_flat, params, *,
                        vmem_budget_bytes=_VMEM_BUDGET_BYTES,
                        max_tk=8192, force_tiled=False):
    """obs_flat/goal_flat: (B, F1) bfloat16.  Returns padded means (B, A_pad) f32."""
    p = params
    B, F1 = obs_flat.shape
    Fp, E = p["W_enc_obs"].shape
    H = p["W1"].shape[1]
    A_pad = p["W_act"].shape[1]
    assert Fp == _round_up(F1, 128), (Fp, F1)

    mode, bt, B_pad, nb, tk, nk = _plan_tiling(
        B, Fp, E, H, A_pad, vmem_budget_bytes=vmem_budget_bytes,
        max_tk=max_tk, force_tiled=force_tiled)

    # Zero-pad batch (sublane granularity) and feature lanes only when actually needed.
    # NOTE: activation-lane zero-padding is required for correctness of the padded
    # feature columns (zero weight rows alone would not protect against garbage lanes).
    if B_pad != B or Fp != F1:
        pads = ((0, B_pad - B), (0, Fp - F1))
        obs_p = jnp.pad(obs_flat, pads)
        goal_p = jnp.pad(goal_flat, pads)
    else:
        obs_p, goal_p = obs_flat, goal_flat

    operands = (obs_p, goal_p,
                p["W_enc_obs"], p["W_enc_goal"], p["b_enc"],
                p["W1"], p["b1"], p["W2"], p["b2"], p["W3"], p["b3"],
                p["W_act"], p["b_act"])

    # Cost estimate (encoder weights are re-fetched once per batch tile in the tiled path).
    flops = 2 * B_pad * (2 * Fp * E + E * H + 2 * H * H + H * A_pad)
    transcendentals = B_pad * (E + 3 * H)
    enc_w_bytes = 2 * Fp * E * 2
    enc_fetches = nb if nk > 1 else 1
    mlp_w_bytes = (E * H + 2 * H * H + H * A_pad) * 2 + (E + 3 * H + A_pad) * 4
    bytes_accessed = (2 * B_pad * Fp * 2 + enc_fetches * enc_w_bytes
                      + mlp_w_bytes + B_pad * A_pad * 4)

    if mode == "single":
        res = lambda shape: pl.BlockSpec(shape, lambda b: (0, 0))
        in_specs = [
            pl.BlockSpec((bt, Fp), lambda b: (b, 0)),          # obs (bf16)
            pl.BlockSpec((bt, Fp), lambda b: (b, 0)),          # goal (bf16)
            res((Fp, E)), res((Fp, E)), res((1, E)),           # W_enc_obs, W_enc_goal, b_enc
            res((E, H)), res((1, H)),                          # W1, b1
            res((H, H)), res((1, H)),                          # W2, b2
            res((H, H)), res((1, H)),                          # W3, b3
            res((H, A_pad)), res((1, A_pad)),                  # W_act, b_act
        ]
        out_specs = pl.BlockSpec((bt, A_pad), lambda b: (b, 0))
        grid = (nb,)
        dim_sem = ("parallel",)
        scratch = []
        kernel = gcbc_kernel_single
    else:
        res = lambda shape: pl.BlockSpec(shape, lambda b, k: (0, 0))
        in_specs = [
            pl.BlockSpec((bt, tk), lambda b, k: (b, k)),       # obs chunk (bf16)
            pl.BlockSpec((bt, tk), lambda b, k: (b, k)),       # goal chunk (bf16)
            pl.BlockSpec((tk, E), lambda b, k: (k, 0)),        # W_enc_obs chunk
            pl.BlockSpec((tk, E), lambda b, k: (k, 0)),        # W_enc_goal chunk
            res((1, E)),                                       # b_enc
            res((E, H)), res((1, H)),                          # W1, b1
            res((H, H)), res((1, H)),                          # W2, b2
            res((H, H)), res((1, H)),                          # W3, b3
            res((H, A_pad)), res((1, A_pad)),                  # W_act, b_act
        ]
        out_specs = pl.BlockSpec((bt, A_pad), lambda b, k: (b, 0))
        grid = (nb, nk)
        dim_sem = ("parallel", "arbitrary")
        scratch = [pltpu.VMEM((bt, E), jnp.float32)]
        kernel = gcbc_kernel_tiled

    means_pad = pl.pallas_call(
        kernel,
        out_shape=jax.ShapeDtypeStruct((B_pad, A_pad), jnp.float32),
        grid=grid,
        in_specs=in_specs,
        out_specs=out_specs,
        scratch_shapes=scratch,
        compiler_params=pltpu.CompilerParams(
            dimension_semantics=dim_sem,
            vmem_limit_bytes=_VMEM_LIMIT_BYTES),
        cost_estimate=pl.CostEstimate(
            flops=flops, transcendentals=transcendentals,
            bytes_accessed=bytes_accessed),
    )(*operands)
    return means_pad[:B]


class GCBCAgentPallas:
    """JAX/Pallas port of GCBCAgent (forward pass, inference semantics)."""

    def __init__(self, per_image_features, encode_dim=512, hidden_dim=256,
                 dropout_rate=0.1, action_dim=7, seed=0):
        del dropout_rate  # identity at inference
        assert encode_dim % 128 == 0 and hidden_dim % 128 == 0, \
            "this kernel requires lane-dense (multiple-of-128) encode/hidden dims"
        self.action_dim = action_dim
        self.F1 = per_image_features
        self.Fp = _round_up(per_image_features, 128)
        a_pad = _round_up(action_dim, 128)  # lane-dense action head (unmasked stores)

        key = jax.random.PRNGKey(seed)
        ks = jax.random.split(key, 11)
        s = 0.02
        w = lambda k, shape: s * jax.random.normal(k, shape, jnp.float32)

        W_eo = jnp.pad(w(ks[0], (self.F1, encode_dim)), ((0, self.Fp - self.F1), (0, 0)))
        W_eg = jnp.pad(w(ks[1], (self.F1, encode_dim)), ((0, self.Fp - self.F1), (0, 0)))
        self.params = {
            # Weight matrices in bf16 (MXU operands / halved DMA); biases in f32.
            "W_enc_obs": W_eo.astype(jnp.bfloat16),
            "W_enc_goal": W_eg.astype(jnp.bfloat16),
            "b_enc": w(ks[2], (1, encode_dim)),
            "W1": w(ks[3], (encode_dim, hidden_dim)).astype(jnp.bfloat16),
            "b1": w(ks[4], (1, hidden_dim)),
            "W2": w(ks[5], (hidden_dim, hidden_dim)).astype(jnp.bfloat16),
            "b2": w(ks[6], (1, hidden_dim)),
            "W3": w(ks[7], (hidden_dim, hidden_dim)).astype(jnp.bfloat16),
            "b3": w(ks[8], (1, hidden_dim)),
            "W_act": jnp.pad(w(ks[9], (hidden_dim, action_dim)),
                             ((0, 0), (0, a_pad - action_dim))).astype(jnp.bfloat16),
            "b_act": jnp.pad(w(ks[10], (1, action_dim)),
                             ((0, 0), (0, a_pad - action_dim))),
        }
        # register_buffer('fixed_std', torch.eye(action_dim))
        self.fixed_std = jnp.eye(action_dim, dtype=jnp.float32)

    def forward(self, obs_imgs, goal_imgs, **plan_kwargs):
        # torch.concat((obs, goal), dim=-3) + flatten is fused into the kernel
        # (split encoder weight); activations ship as bf16 (halved DMA, no in-kernel cast).
        B = obs_imgs.shape[0]
        obs_flat = obs_imgs.reshape(B, -1).astype(jnp.bfloat16)
        goal_flat = goal_imgs.reshape(B, -1).astype(jnp.bfloat16)
        means = gcbc_forward_pallas(obs_flat, goal_flat, self.params, **plan_kwargs)
        means = means[:, :self.action_dim]
        # MultivariateNormal(means, scale_tril=fixed_std) represented as a tuple.
        return means, self.fixed_std

    def sample_actions(self, obs_img, goal_img, argmax=True):
        means, _ = self.forward(obs_img, goal_img)
        # argmax -> dist.mode == means for MVN with identity scale_tril
        return means


def _reference_forward(agent, obs_imgs, goal_imgs):
    """Pure-JAX reference (same bf16-operand / f32-accumulate math as the kernel)."""
    p = agent.params
    B = obs_imgs.shape[0]
    obs = obs_imgs.reshape(B, -1).astype(jnp.float32)
    goal = goal_imgs.reshape(B, -1).astype(jnp.float32)
    Fp = p["W_enc_obs"].shape[0]
    obs = jnp.pad(obs, ((0, 0), (0, Fp - obs.shape[1])))
    goal = jnp.pad(goal, ((0, 0), (0, Fp - goal.shape[1])))
    dot = lambda a, w: jnp.dot(a.astype(jnp.bfloat16), w,
                               preferred_element_type=jnp.float32)
    h = _silu(dot(obs, p["W_enc_obs"]) + dot(goal, p["W_enc_goal"]) + p["b_enc"])
    h = _silu(dot(h, p["W1"]) + p["b1"])
    h = _silu(dot(h, p["W2"]) + p["b2"])
    h = _silu(dot(h, p["W3"]) + p["b3"])
    return (dot(h, p["W_act"]) + p["b_act"])[:, :agent.action_dim]


if __name__ == "__main__":
    B, C, Hh, Ww = 2, 4, 16, 16
    key = jax.random.PRNGKey(0)
    k_obs, k_goal = jax.random.split(key)
    obs_imgs = jax.random.uniform(k_obs, (B, C, Hh, Ww), jnp.float32)
    goal_imgs = jax.random.uniform(k_goal, (B, C, Hh, Ww), jnp.float32)

    agent = GCBCAgentPallas(per_image_features=C * Hh * Ww,
                            encode_dim=128, hidden_dim=128, action_dim=7, seed=0)
    ref = _reference_forward(agent, obs_imgs, goal_imgs)

    # Default path: weights fit VMEM -> single-pass kernel (nk == 1, no accumulator).
    means, scale_tril = agent.forward(obs_imgs, goal_imgs)
    means = jax.block_until_ready(means)
    assert means.shape == (B, 7), means.shape
    assert scale_tril.shape == (7, 7), scale_tril.shape
    assert jnp.allclose(means, ref, atol=1e-3, rtol=1e-3), (means, ref)

    # Also exercise the k-tiled accumulator path (used when encoder weights exceed VMEM).
    means_tiled, _ = agent.forward(obs_imgs, goal_imgs, force_tiled=True, max_tk=512)
    means_tiled = jax.block_until_ready(means_tiled)
    assert jnp.allclose(means_tiled, ref, atol=1e-3, rtol=1e-3), (means_tiled, ref)

    acts = jax.block_until_ready(agent.sample_actions(obs_imgs, goal_imgs, argmax=True))
    assert acts.shape == (B, 7)

    print("KERNEL_OK")
</pallas_src>

<mosaic_0001>
module attributes {stable_mosaic.version = 11 : i64} {
  func.func @gcbc_kernel_single(%arg0: i32, %arg1: memref<8x1024xbf16, #tpu.memory_space<vmem>>, %arg2: memref<8x1024xbf16, #tpu.memory_space<vmem>>, %arg3: memref<1024x128xbf16, #tpu.memory_space<vmem>>, %arg4: memref<1024x128xbf16, #tpu.memory_space<vmem>>, %arg5: memref<1x128xf32, #tpu.memory_space<vmem>>, %arg6: memref<128x128xbf16, #tpu.memory_space<vmem>>, %arg7: memref<1x128xf32, #tpu.memory_space<vmem>>, %arg8: memref<128x128xbf16, #tpu.memory_space<vmem>>, %arg9: memref<1x128xf32, #tpu.memory_space<vmem>>, %arg10: memref<128x128xbf16, #tpu.memory_space<vmem>>, %arg11: memref<1x128xf32, #tpu.memory_space<vmem>>, %arg12: memref<128x128xbf16, #tpu.memory_space<vmem>>, %arg13: memref<1x128xf32, #tpu.memory_space<vmem>>, %arg14: memref<8x128xf32, #tpu.memory_space<vmem>>) attributes {dimension_semantics = [#tpu.dimension_semantics<parallel>], iteration_bounds = array<i64: 1>, scalar_prefetch = 0 : i64, scratch_operands = 0 : i64, tpu.core_type = #tpu.core_type<tc>, window_params = [{transform_indices = @transform_0, window_bounds = array<i64: 8, 1024>}, {transform_indices = @transform_1, window_bounds = array<i64: 8, 1024>}, {pipeline_mode = #tpu.pipeline_mode<synchronous>, transform_indices = @transform_2, window_bounds = array<i64: 1024, 128>}, {pipeline_mode = #tpu.pipeline_mode<synchronous>, transform_indices = @transform_3, window_bounds = array<i64: 1024, 128>}, {pipeline_mode = #tpu.pipeline_mode<synchronous>, transform_indices = @transform_4, window_bounds = array<i64: 1, 128>}, {pipeline_mode = #tpu.pipeline_mode<synchronous>, transform_indices = @transform_5, window_bounds = array<i64: 128, 128>}, {pipeline_mode = #tpu.pipeline_mode<synchronous>, transform_indices = @transform_6, window_bounds = array<i64: 1, 128>}, {pipeline_mode = #tpu.pipeline_mode<synchronous>, transform_indices = @transform_7, window_bounds = array<i64: 128, 128>}, {pipeline_mode = #tpu.pipeline_mode<synchronous>, transform_indices = @transform_8, window_bounds = array<i64: 1, 128>}, {pipeline_mode = #tpu.pipeline_mode<synchronous>, transform_indices = @transform_9, window_bounds = array<i64: 128, 128>}, {pipeline_mode = #tpu.pipeline_mode<synchronous>, transform_indices = @transform_10, window_bounds = array<i64: 1, 128>}, {pipeline_mode = #tpu.pipeline_mode<synchronous>, transform_indices = @transform_11, window_bounds = array<i64: 128, 128>}, {pipeline_mode = #tpu.pipeline_mode<synchronous>, transform_indices = @transform_12, window_bounds = array<i64: 1, 128>}, {transform_indices = @transform_13, window_bounds = array<i64: 8, 128>}]} {
    %c0 = arith.constant 0 : index
    %c0_0 = arith.constant 0 : index
    %0 = vector.load %arg1[%c0, %c0_0] : memref<8x1024xbf16, #tpu.memory_space<vmem>>, vector<8x1024xbf16>
    %c0_1 = arith.constant 0 : index
    %c0_2 = arith.constant 0 : index
    %1 = vector.load %arg3[%c0_1, %c0_2] : memref<1024x128xbf16, #tpu.memory_space<vmem>>, vector<1024x128xbf16>
    %cst = arith.constant dense<0.000000e+00> : vector<8x128xf32>
    %2 = tpu.matmul %0, %1, %cst {dimension_numbers = #tpu.dot_dimension_numbers<[1], [0], [0], [1], [0, 0, 1, 1], [], []>} : vector<8x1024xbf16>, vector<1024x128xbf16>, vector<8x128xf32> -> vector<8x128xf32>
    %c0_3 = arith.constant 0 : index
    %c0_4 = arith.constant 0 : index
    %3 = vector.load %arg2[%c0_3, %c0_4] : memref<8x1024xbf16, #tpu.memory_space<vmem>>, vector<8x1024xbf16>
    %c0_5 = arith.constant 0 : index
    %c0_6 = arith.constant 0 : index
    %4 = vector.load %arg4[%c0_5, %c0_6] : memref<1024x128xbf16, #tpu.memory_space<vmem>>, vector<1024x128xbf16>
    %cst_7 = arith.constant dense<0.000000e+00> : vector<8x128xf32>
    %5 = tpu.matmul %3, %4, %cst_7 {dimension_numbers = #tpu.dot_dimension_numbers<[1], [0], [0], [1], [0, 0, 1, 1], [], []>} : vector<8x1024xbf16>, vector<1024x128xbf16>, vector<8x128xf32> -> vector<8x128xf32>
    %6 = arith.addf %2, %5 : vector<8x128xf32>
    %c0_8 = arith.constant 0 : index
    %c0_9 = arith.constant 0 : index
    %7 = vector.load %arg5[%c0_8, %c0_9] : memref<1x128xf32, #tpu.memory_space<vmem>>, vector<1x128xf32>
    %8 = vector.broadcast %7 : vector<1x128xf32> to vector<8x128xf32>
    %9 = arith.addf %6, %8 : vector<8x128xf32>
    %cst_10 = arith.constant 5.000000e-01 : f32
    %10 = vector.broadcast %cst_10 : f32 to vector<8x128xf32>
    %11 = arith.mulf %10, %9 : vector<8x128xf32>
    %12 = math.tanh %11 : vector<8x128xf32>
    %cst_11 = arith.constant 1.000000e+00 : f32
    %13 = vector.broadcast %cst_11 : f32 to vector<8x128xf32>
    %14 = arith.addf %12, %13 : vector<8x128xf32>
    %cst_12 = arith.constant 5.000000e-01 : f32
    %15 = vector.broadcast %cst_12 : f32 to vector<8x128xf32>
    %16 = arith.mulf %15, %14 : vector<8x128xf32>
    %17 = arith.mulf %9, %16 : vector<8x128xf32>
    %18 = arith.truncf %17 : vector<8x128xf32> to vector<8x128xbf16>
    %c0_13 = arith.constant 0 : index
    %c0_14 = arith.constant 0 : index
    %19 = vector.load %arg6[%c0_13, %c0_14] : memref<128x128xbf16, #tpu.memory_space<vmem>>, vector<128x128xbf16>
    %cst_15 = arith.constant dense<0.000000e+00> : vector<8x128xf32>
    %20 = tpu.matmul %18, %19, %cst_15 {dimension_numbers = #tpu.dot_dimension_numbers<[1], [0], [0], [1], [0, 0, 1, 1], [], []>} : vector<8x128xbf16>, vector<128x128xbf16>, vector<8x128xf32> -> vector<8x128xf32>
    %c0_16 = arith.constant 0 : index
    %c0_17 = arith.constant 0 : index
    %21 = vector.load %arg7[%c0_16, %c0_17] : memref<1x128xf32, #tpu.memory_space<vmem>>, vector<1x128xf32>
    %22 = vector.broadcast %21 : vector<1x128xf32> to vector<8x128xf32>
    %23 = arith.addf %20, %22 : vector<8x128xf32>
    %cst_18 = arith.constant 5.000000e-01 : f32
    %24 = vector.broadcast %cst_18 : f32 to vector<8x128xf32>
    %25 = arith.mulf %24, %23 : vector<8x128xf32>
    %26 = math.tanh %25 : vector<8x128xf32>
    %cst_19 = arith.constant 1.000000e+00 : f32
    %27 = vector.broadcast %cst_19 : f32 to vector<8x128xf32>
    %28 = arith.addf %26, %27 : vector<8x128xf32>
    %cst_20 = arith.constant 5.000000e-01 : f32
    %29 = vector.broadcast %cst_20 : f32 to vector<8x128xf32>
    %30 = arith.mulf %29, %28 : vector<8x128xf32>
    %31 = arith.mulf %23, %30 : vector<8x128xf32>
    %32 = arith.truncf %31 : vector<8x128xf32> to vector<8x128xbf16>
    %c0_21 = arith.constant 0 : index
    %c0_22 = arith.constant 0 : index
    %33 = vector.load %arg8[%c0_21, %c0_22] : memref<128x128xbf16, #tpu.memory_space<vmem>>, vector<128x128xbf16>
    %cst_23 = arith.constant dense<0.000000e+00> : vector<8x128xf32>
    %34 = tpu.matmul %32, %33, %cst_23 {dimension_numbers = #tpu.dot_dimension_numbers<[1], [0], [0], [1], [0, 0, 1, 1], [], []>} : vector<8x128xbf16>, vector<128x128xbf16>, vector<8x128xf32> -> vector<8x128xf32>
    %c0_24 = arith.constant 0 : index
    %c0_25 = arith.constant 0 : index
    %35 = vector.load %arg9[%c0_24, %c0_25] : memref<1x128xf32, #tpu.memory_space<vmem>>, vector<1x128xf32>
    %36 = vector.broadcast %35 : vector<1x128xf32> to vector<8x128xf32>
    %37 = arith.addf %34, %36 : vector<8x128xf32>
    %cst_26 = arith.constant 5.000000e-01 : f32
    %38 = vector.broadcast %cst_26 : f32 to vector<8x128xf32>
    %39 = arith.mulf %38, %37 : vector<8x128xf32>
    %40 = math.tanh %39 : vector<8x128xf32>
    %cst_27 = arith.constant 1.000000e+00 : f32
    %41 = vector.broadcast %cst_27 : f32 to vector<8x128xf32>
    %42 = arith.addf %40, %41 : vector<8x128xf32>
    %cst_28 = arith.constant 5.000000e-01 : f32
    %43 = vector.broadcast %cst_28 : f32 to vector<8x128xf32>
    %44 = arith.mulf %43, %42 : vector<8x128xf32>
    %45 = arith.mulf %37, %44 : vector<8x128xf32>
    %46 = arith.truncf %45 : vector<8x128xf32> to vector<8x128xbf16>
    %c0_29 = arith.constant 0 : index
    %c0_30 = arith.constant 0 : index
    %47 = vector.load %arg10[%c0_29, %c0_30] : memref<128x128xbf16, #tpu.memory_space<vmem>>, vector<128x128xbf16>
    %cst_31 = arith.constant dense<0.000000e+00> : vector<8x128xf32>
    %48 = tpu.matmul %46, %47, %cst_31 {dimension_numbers = #tpu.dot_dimension_numbers<[1], [0], [0], [1], [0, 0, 1, 1], [], []>} : vector<8x128xbf16>, vector<128x128xbf16>, vector<8x128xf32> -> vector<8x128xf32>
    %c0_32 = arith.constant 0 : index
    %c0_33 = arith.constant 0 : index
    %49 = vector.load %arg11[%c0_32, %c0_33] : memref<1x128xf32, #tpu.memory_space<vmem>>, vector<1x128xf32>
    %50 = vector.broadcast %49 : vector<1x128xf32> to vector<8x128xf32>
    %51 = arith.addf %48, %50 : vector<8x128xf32>
    %cst_34 = arith.constant 5.000000e-01 : f32
    %52 = vector.broadcast %cst_34 : f32 to vector<8x128xf32>
    %53 = arith.mulf %52, %51 : vector<8x128xf32>
    %54 = math.tanh %53 : vector<8x128xf32>
    %cst_35 = arith.constant 1.000000e+00 : f32
    %55 = vector.broadcast %cst_35 : f32 to vector<8x128xf32>
    %56 = arith.addf %54, %55 : vector<8x128xf32>
    %cst_36 = arith.constant 5.000000e-01 : f32
    %57 = vector.broadcast %cst_36 : f32 to vector<8x128xf32>
    %58 = arith.mulf %57, %56 : vector<8x128xf32>
    %59 = arith.mulf %51, %58 : vector<8x128xf32>
    %60 = arith.truncf %59 : vector<8x128xf32> to vector<8x128xbf16>
    %c0_37 = arith.constant 0 : index
    %c0_38 = arith.constant 0 : index
    %61 = vector.load %arg12[%c0_37, %c0_38] : memref<128x128xbf16, #tpu.memory_space<vmem>>, vector<128x128xbf16>
    %cst_39 = arith.constant dense<0.000000e+00> : vector<8x128xf32>
    %62 = tpu.matmul %60, %61, %cst_39 {dimension_numbers = #tpu.dot_dimension_numbers<[1], [0], [0], [1], [0, 0, 1, 1], [], []>} : vector<8x128xbf16>, vector<128x128xbf16>, vector<8x128xf32> -> vector<8x128xf32>
    %c0_40 = arith.constant 0 : index
    %c0_41 = arith.constant 0 : index
    %63 = vector.load %arg13[%c0_40, %c0_41] : memref<1x128xf32, #tpu.memory_space<vmem>>, vector<1x128xf32>
    %64 = vector.broadcast %63 : vector<1x128xf32> to vector<8x128xf32>
    %65 = arith.addf %62, %64 : vector<8x128xf32>
    %c0_42 = arith.constant 0 : index
    %c0_43 = arith.constant 0 : index
    %66 = vector.load %arg14[%c0_42, %c0_43] : memref<8x128xf32, #tpu.memory_space<vmem>>, vector<8x128xf32>
    tpu.vector_store %arg14[%c0_42, %c0_43], %65 {strides = array<i32>} : memref<8x128xf32, #tpu.memory_space<vmem>>, vector<8x128xf32>,
    return
  }
  func.func @transform_0(%arg0: i32) -> (i32, i32) {
    %c0_i32 = arith.constant 0 : i32
    %c0_i32_0 = arith.constant 0 : i32
    return %arg0, %c0_i32 : i32, i32
  }
  func.func @transform_1(%arg0: i32) -> (i32, i32) {
    %c0_i32 = arith.constant 0 : i32
    %c0_i32_0 = arith.constant 0 : i32
    return %arg0, %c0_i32 : i32, i32
  }
  func.func @transform_2(%arg0: i32) -> (i32, i32) {
    %c0_i32 = arith.constant 0 : i32
    %c0_i32_0 = arith.constant 0 : i32
    %c0_i32_1 = arith.constant 0 : i32
    return %c0_i32, %c0_i32_0 : i32, i32
  }
  func.func @transform_3(%arg0: i32) -> (i32, i32) {
    %c0_i32 = arith.constant 0 : i32
    %c0_i32_0 = arith.constant 0 : i32
    %c0_i32_1 = arith.constant 0 : i32
    return %c0_i32, %c0_i32_0 : i32, i32
  }
  func.func @transform_4(%arg0: i32) -> (i32, i32) {
    %c0_i32 = arith.constant 0 : i32
    %c0_i32_0 = arith.constant 0 : i32
    %c0_i32_1 = arith.constant 0 : i32
    return %c0_i32, %c0_i32_0 : i32, i32
  }
  func.func @transform_5(%arg0: i32) -> (i32, i32) {
    %c0_i32 = arith.constant 0 : i32
    %c0_i32_0 = arith.constant 0 : i32
    %c0_i32_1 = arith.constant 0 : i32
    return %c0_i32, %c0_i32_0 : i32, i32
  }
  func.func @transform_6(%arg0: i32) -> (i32, i32) {
    %c0_i32 = arith.constant 0 : i32
    %c0_i32_0 = arith.constant 0 : i32
    %c0_i32_1 = arith.constant 0 : i32
    return %c0_i32, %c0_i32_0 : i32, i32
  }
  func.func @transform_7(%arg0: i32) -> (i32, i32) {
    %c0_i32 = arith.constant 0 : i32
    %c0_i32_0 = arith.constant 0 : i32
    %c0_i32_1 = arith.constant 0 : i32
    return %c0_i32, %c0_i32_0 : i32, i32
  }
  func.func @transform_8(%arg0: i32) -> (i32, i32) {
    %c0_i32 = arith.constant 0 : i32
    %c0_i32_0 = arith.constant 0 : i32
    %c0_i32_1 = arith.constant 0 : i32
    return %c0_i32, %c0_i32_0 : i32, i32
  }
  func.func @transform_9(%arg0: i32) -> (i32, i32) {
    %c0_i32 = arith.constant 0 : i32
    %c0_i32_0 = arith.constant 0 : i32
    %c0_i32_1 = arith.constant 0 : i32
    return %c0_i32, %c0_i32_0 : i32, i32
  }
  func.func @transform_10(%arg0: i32) -> (i32, i32) {
    %c0_i32 = arith.constant 0 : i32
    %c0_i32_0 = arith.constant 0 : i32
    %c0_i32_1 = arith.constant 0 : i32
    return %c0_i32, %c0_i32_0 : i32, i32
  }
  func.func @transform_11(%arg0: i32) -> (i32, i32) {
    %c0_i32 = arith.constant 0 : i32
    %c0_i32_0 = arith.constant 0 : i32
    %c0_i32_1 = arith.constant 0 : i32
    return %c0_i32, %c0_i32_0 : i32, i32
  }
  func.func @transform_12(%arg0: i32) -> (i32, i32) {
    %c0_i32 = arith.constant 0 : i32
    %c0_i32_0 = arith.constant 0 : i32
    %c0_i32_1 = arith.constant 0 : i32
    return %c0_i32, %c0_i32_0 : i32, i32
  }
  func.func @transform_13(%arg0: i32) -> (i32, i32) {
    %c0_i32 = arith.constant 0 : i32
    %c0_i32_0 = arith.constant 0 : i32
    return %arg0, %c0_i32 : i32, i32
  }
}

</mosaic_0001>

<bundles_post_ra>
// kernel: tpu_custom_call.1
= control target key start
LH: loop header
LB: loop body
LE: loop exit
PB: predicated region body
PF: predicated region fallthrough
CT: control target
= control target key end

     0   :  { %18 = vsyncpa [#allocation3], 0  ;;  %s3199_s0 = inlined_call_operand.hbm [shape: bf16[8,1024], index: 0, kind: input, shape index: {}]   ;;  %s3200_s1 = inlined_call_operand.hbm [shape: bf16[8,1024], index: 1, kind: input, shape index: {}]   ;;  %s3201_s2 = inlined_call_operand.hbm [shape: bf16[1024,128], index: 2, kind: input, shape index: {}]   ;;  %s3202_s3 = inlined_call_operand.hbm [shape: bf16[1024,128], index: 3, kind: input, shape index: {}]   ;;  %s3203_s4 = inlined_call_operand.vmem [shape: f32[1,128], index: 4, kind: input, shape index: {}]   ;;  %s3204_s5 = inlined_call_operand.hbm [shape: bf16[128,128], index: 5, kind: input, shape index: {}]   ;;  %s3205_s6 = inlined_call_operand.vmem [shape: f32[1,128], index: 6, kind: input, shape index: {}]   ;;  %s3206_s7 = inlined_call_operand.hbm [shape: bf16[128,128], index: 7, kind: input, shape index: {}]   ;;  %s3207_s8 = inlined_call_operand.vmem [shape: f32[1,128], index: 8, kind: input, shape index: {}]   ;;  %s3208_s9 = inlined_call_operand.hbm [shape: bf16[128,128], index: 9, kind: input, shape index: {}]   ;;  %s3209_s10 = inlined_call_operand.vmem [shape: f32[1,128], index: 10, kind: input, shape index: {}]   ;;  %s3210_s11 = inlined_call_operand.hbm [shape: bf16[128,128], index: 11, kind: input, shape index: {}]   ;;  %s3211_s12 = inlined_call_operand.vmem [shape: f32[1,128], index: 12, kind: input, shape index: {}]   ;;  %s3212_s13 = inlined_call_operand.hbm [shape: f32[8,128], index: 13, kind: output, shape index: {}]  }
   0x1   :  { %19 = vsyncpa [#allocation6], 0 }
   0x2   :  { %20 = vsyncpa [#allocation9], 0 }
   0x3   :  { %21 = vsyncpa [#allocation12], 0 }
   0x4   :  { %22 = vsyncpa [#allocation15], 0 }
   0x5   :  { %23 = vsyncpa [#allocation4], 0  ;;  %s2935_s25 = smov [#allocation5]   ;;  %s2725_s29 = scalar_lea.hbm %s3200_s1, 512 }
   0x6   :  { %s40_s26 = sshll.u32 %s2935_s25, 4  ;;  %p2726_p0 = scmp.ne.s32.totalorder %s3200_s1, %s2725_s29  ;;  %s41_s26 = int_to_ptr.vmem [resolvable:$true] %s40_s26 }
   0x7   :  { %p2729_p1 = scmp.lt.u32.totalorder %s2725_s29, %s3200_s1 }
   0x9   :  { %p2731_p2 = pnand %p2729_p1, %p2726_p0 }
   0xb   :  { %2734 = shalt.err (!%p2731_p2)
}
   0xc   :  { %s2735_s17 = scalar_lea.vmem %s41_s26, 512  ;;  %p2740_p4 = scmp.lt.s32.totalorder %s41_s26, %s41_s26 }
   0xd   :  { %p2736_p3 = scmp.ne.s32.totalorder %s41_s26, %s2735_s17  ;;  %p2741_p5 = scmp.lt.s32.totalorder %s2735_s17, %s2735_s17 }
   0xf   :  { %p2742_p6 = por %p2741_p5, %p2740_p4 }
  0x11   :  { %p2743_p7 = pnand %p2742_p6, %p2736_p3 }
  0x13   :  { %2746 = shalt.err (!%p2743_p7)
}
  0x14   :  { %43 = dma.hbm_to_vmem [thread:$0]  %s3200_s1, 512, %s41_s26, [#allocation6]  }
  0x15   :  { %s2936_s20 = smov [#allocation8]   ;;  %s2937_s22 = smov [#allocation11]  }
  0x16   :  { %s61_s21 = sshll.u32 %s2936_s20, 4  ;;  %s89_s23 = sshll.u32 %s2937_s22, 4  ;;  %s62_s21 = int_to_ptr.vmem [resolvable:$true] %s61_s21  ;;  %s90_s23 = int_to_ptr.vmem [resolvable:$true] %s89_s23 }
  0x17   :  { %s2747_s27 = scalar_lea.hbm %s3202_s3, 8192 }
  0x18   :  { %p2748_p8 = scmp.ne.s32.totalorder %s3202_s3, %s2747_s27  ;;  %p2751_p9 = scmp.lt.u32.totalorder %s2747_s27, %s3202_s3 }
  0x1a   :  { %p2753_p10 = pnand %p2751_p9, %p2748_p8 }
  0x1c   :  { %2756 = shalt.err (!%p2753_p10)
}
  0x1d   :  { %s2757_s1 = scalar_lea.vmem %s62_s21, 8192  ;;  %p2762_p12 = scmp.lt.s32.totalorder %s62_s21, %s62_s21 }
  0x1e   :  { %p2758_p11 = scmp.ne.s32.totalorder %s62_s21, %s2757_s1  ;;  %p2763_p13 = scmp.lt.s32.totalorder %s2757_s1, %s2757_s1 }
  0x20   :  { %p2764_p0 = por %p2763_p13, %p2762_p12 }
  0x22   :  { %p2765_p1 = pnand %p2764_p0, %p2758_p11 }
  0x24   :  { %2768 = shalt.err (!%p2765_p1)
}
  0x25   :  { %s2938_s26 = smov 64   ;;  %s2939_s15 = smov 4  }
  0x26   :  { %67 = dma.hbm_to_vmem [thread:$0]  %s3202_s3, 8192, %s62_s21, [#allocation9], %s2938_s26, %s2938_s26, %s2939_s15  }
  0x27   :  { %s2769_s20 = scalar_lea.hbm %s3206_s7, 1024 }
  0x28   :  { %p2770_p2 = scmp.ne.s32.totalorder %s3206_s7, %s2769_s20  ;;  %p2773_p3 = scmp.lt.u32.totalorder %s2769_s20, %s3206_s7 }
  0x2a   :  { %p2775_p4 = pnand %p2773_p3, %p2770_p2 }
  0x2c   :  { %2778 = shalt.err (!%p2775_p4)
}
  0x2d   :  { %s2779_s28 = scalar_lea.vmem %s90_s23, 1024  ;;  %p2784_p6 = scmp.lt.s32.totalorder %s90_s23, %s90_s23 }
  0x2e   :  { %p2780_p5 = scmp.ne.s32.totalorder %s90_s23, %s2779_s28  ;;  %p2785_p7 = scmp.lt.s32.totalorder %s2779_s28, %s2779_s28 }
  0x30   :  { %p2786_p8 = por %p2785_p7, %p2784_p6 }
  0x32   :  { %p2787_p9 = pnand %p2786_p8, %p2780_p5 }
  0x34   :  { %2790 = shalt.err (!%p2787_p9)
}
  0x35   :  { %95 = dma.hbm_to_vmem [thread:$0]  %s3206_s7, 1024, %s90_s23, [#allocation12], %s2938_s26, %s2938_s26, %s2939_s15  }
  0x36   :  { %s2940_s29 = smov [#allocation2]   ;;  %s2941_s14 = smov [#allocation7]  }
  0x37   :  { %s30_s30 = sshll.u32 %s2940_s29, 4  ;;  %s49_s1 = sshll.u32 %s2941_s14, 4  ;;  %s31_s30 = int_to_ptr.vmem [resolvable:$true] %s30_s30  ;;  %s50_s1 = int_to_ptr.vmem [resolvable:$true] %s49_s1 }
  0x38   :  { %s2791_s18 = scalar_lea.hbm %s3199_s0, 512 }
  0x39   :  { %p2792_p10 = scmp.ne.s32.totalorder %s3199_s0, %s2791_s18  ;;  %p2795_p11 = scmp.lt.u32.totalorder %s2791_s18, %s3199_s0 }
  0x3b   :  { %p2797_p12 = pnand %p2795_p11, %p2792_p10 }
  0x3d   :  { %2800 = shalt.err (!%p2797_p12)
}
  0x3e   :  { %s2801_s7 = scalar_lea.vmem %s31_s30, 512  ;;  %p2806_p0 = scmp.lt.s32.totalorder %s31_s30, %s31_s30 }
  0x3f   :  { %p2802_p13 = scmp.ne.s32.totalorder %s31_s30, %s2801_s7  ;;  %p2807_p1 = scmp.lt.s32.totalorder %s2801_s7, %s2801_s7 }
  0x41   :  { %p2808_p2 = por %p2807_p1, %p2806_p0 }
  0x43   :  { %p2809_p3 = pnand %p2808_p2, %p2802_p13 }
  0x45   :  { %2812 = shalt.err (!%p2809_p3)
}
  0x46   :  { %33 = dma.hbm_to_vmem [thread:$0]  %s3199_s0, 512, %s31_s30, [#allocation3]  }
  0x47   :  { %s2813_s3 = scalar_lea.hbm %s3201_s2, 8192 }
  0x48   :  { %p2814_p4 = scmp.ne.s32.totalorder %s3201_s2, %s2813_s3  ;;  %p2817_p5 = scmp.lt.u32.totalorder %s2813_s3, %s3201_s2 }
  0x4a   :  { %p2819_p6 = pnand %p2817_p5, %p2814_p4 }
  0x4c   :  { %2822 = shalt.err (!%p2819_p6)
}
  0x4d   :  { %s2823_s17 = scalar_lea.vmem %s50_s1, 8192  ;;  %p2828_p8 = scmp.lt.s32.totalorder %s50_s1, %s50_s1 }
  0x4e   :  { %p2824_p7 = scmp.ne.s32.totalorder %s50_s1, %s2823_s17  ;;  %p2829_p9 = scmp.lt.s32.totalorder %s2823_s17, %s2823_s17 }
  0x50   :  { %p2830_p10 = por %p2829_p9, %p2828_p8 }
  0x52   :  { %p2831_p11 = pnand %p2830_p10, %p2824_p7 }
  0x54   :  { %2834 = shalt.err (!%p2831_p11)
}
  0x55   :  { %55 = dma.hbm_to_vmem [thread:$0]  %s3201_s2, 8192, %s50_s1, [#allocation6], %s2938_s26, %s2938_s26, %s2939_s15  }
  0x56   :  { %s2942_s18 = smov [#allocation10]   ;;  %s2943_s20 = smov [#allocation13]  }
  0x57   :  { %s75_s19 = sshll.u32 %s2942_s18, 4  ;;  %s103_s22 = sshll.u32 %s2943_s20, 4  ;;  %s76_s19 = int_to_ptr.vmem [resolvable:$true] %s75_s19  ;;  %s104_s22 = int_to_ptr.vmem [resolvable:$true] %s103_s22 }
  0x58   :  { %s2835_s23 = scalar_lea.hbm %s3204_s5, 1024 }
  0x59   :  { %p2836_p12 = scmp.ne.s32.totalorder %s3204_s5, %s2835_s23  ;;  %p2839_p13 = scmp.lt.u32.totalorder %s2835_s23, %s3204_s5 }
  0x5b   :  { %p2841_p0 = pnand %p2839_p13, %p2836_p12 }
  0x5d   :  { %2844 = shalt.err (!%p2841_p0)
}
  0x5e   :  { %s2845_s2 = scalar_lea.vmem %s76_s19, 1024  ;;  %p2850_p2 = scmp.lt.s32.totalorder %s76_s19, %s76_s19 }
  0x5f   :  { %p2846_p1 = scmp.ne.s32.totalorder %s76_s19, %s2845_s2  ;;  %p2851_p3 = scmp.lt.s32.totalorder %s2845_s2, %s2845_s2 }
  0x61   :  { %p2852_p4 = por %p2851_p3, %p2850_p2 }
  0x63   :  { %p2853_p5 = pnand %p2852_p4, %p2846_p1 }
  0x65   :  { %2856 = shalt.err (!%p2853_p5)
}
  0x66   :  { %81 = dma.hbm_to_vmem [thread:$0]  %s3204_s5, 1024, %s76_s19, [#allocation9], %s2938_s26, %s2938_s26, %s2939_s15  }
  0x67   :  { %s2857_s16 = scalar_lea.hbm %s3208_s9, 1024 }
  0x68   :  { %p2858_p6 = scmp.ne.s32.totalorder %s3208_s9, %s2857_s16  ;;  %p2861_p7 = scmp.lt.u32.totalorder %s2857_s16, %s3208_s9 }
  0x6a   :  { %p2863_p8 = pnand %p2861_p7, %p2858_p6 }
  0x6c   :  { %2866 = shalt.err (!%p2863_p8)
}
  0x6d   :  { %s2867_s20 = scalar_lea.vmem %s104_s22, 1024  ;;  %p2872_p10 = scmp.lt.s32.totalorder %s104_s22, %s104_s22 }
  0x6e   :  { %p2868_p9 = scmp.ne.s32.totalorder %s104_s22, %s2867_s20  ;;  %p2873_p11 = scmp.lt.s32.totalorder %s2867_s20, %s2867_s20 }
  0x70   :  { %p2874_p12 = por %p2873_p11, %p2872_p10 }
  0x72   :  { %p2875_p13 = pnand %p2874_p12, %p2868_p9 }
  0x74   :  { %2878 = shalt.err (!%p2875_p13)
}
  0x75   :  { %109 = dma.hbm_to_vmem [thread:$0]  %s3208_s9, 1024, %s104_s22, [#allocation12], %s2938_s26, %s2938_s26, %s2939_s15  }
  0x76   :  { %s2944_s24 = smov [#allocation14]   ;;  %s2879_s27 = scalar_lea.hbm %s3210_s11, 1024 }
  0x77   :  { %s117_s7 = sshll.u32 %s2944_s24, 4  ;;  %p2880_p0 = scmp.ne.s32.totalorder %s3210_s11, %s2879_s27  ;;  %s118_s7 = int_to_ptr.vmem [resolvable:$true] %s117_s7 }
  0x78   :  { %p2883_p1 = scmp.lt.u32.totalorder %s2879_s27, %s3210_s11 }
  0x7a   :  { %p2885_p2 = pnand %p2883_p1, %p2880_p0 }
  0x7c   :  { %2888 = shalt.err (!%p2885_p2)
}
  0x7d   :  { %s2889_s21 = scalar_lea.vmem %s118_s7, 1024  ;;  %p2894_p4 = scmp.lt.s32.totalorder %s118_s7, %s118_s7 }
  0x7e   :  { %p2890_p3 = scmp.ne.s32.totalorder %s118_s7, %s2889_s21  ;;  %p2895_p5 = scmp.lt.s32.totalorder %s2889_s21, %s2889_s21 }
  0x80   :  { %p2896_p6 = por %p2895_p5, %p2894_p4 }
  0x82   :  { %p2897_p7 = pnand %p2896_p6, %p2890_p3 }
  0x84   :  { %2900 = shalt.err (!%p2897_p7)
}
  0x85   :  { %123 = dma.hbm_to_vmem [thread:$0]  %s3210_s11, 1024, %s118_s7, [#allocation15], %s2938_s26, %s2938_s26, %s2939_s15  }
  0x86   :  { %2923 = dma.done.wait [#allocation3], 512  }
  0x87   :  { %2924 = vsyncadd [#allocation3], 4294966784 }
  0x88   :  { %2925 = dma.done.wait [#allocation6], 8704  }
  0x89   :  { %2926 = vsyncadd [#allocation6], 4294958592 }
  0x8a   :  { %2927 = dma.done.wait [#allocation9], 9216  }
  0x8b   :  { %2928 = vsyncadd [#allocation9], 4294958080 }
  0x8c   :  { %2929 = dma.done.wait [#allocation12], 2048  }
  0x8d   :  { %2930 = vsyncadd [#allocation12], 4294965248 }
  0x8e   :  { %2931 = dma.done.wait [#allocation15], 1024  }
  0x8f   :  { %2932 = vsyncadd [#allocation15], 4294966272  ;;  %v2541_v0 = vld [vmem:[#allocation8 + $0x40] sm:$0xff]   ;;  %v2545_v4 = vld [vmem:[#allocation8 + $0x48] sm:$0xff]   ;;  %vm2946_vm0 = vmmov 0   ;;  %s2947_s0 = smov [#allocation16]  }
  0x90   :  { %v2542_v1 = vld [vmem:[#allocation8 + $0xc0] sm:$0xff]   ;;  %2236 = vmatprep.subr.bf16.mxu0 %v2541_v0  ;;  %v2546_v5 = vld [vmem:[#allocation8 + $0xc8] sm:$0xff]   ;;  %v2549_v8 = vld [vmem:[#allocation8 + $0x50] sm:$0xff]   ;;  %s2042_s30 = sshll.u32 %s2947_s0, 4  ;;  %s2043_s30 = int_to_ptr.vmem [resolvable:$true] %s2042_s30 }
  0x91   :  { %v2543_v2 = vld [vmem:[#allocation8] sm:$0xff]   ;;  %2258 = vmatprep.subr.bf16.mxu1 %v2542_v1  ;;  %v2547_v6 = vld [vmem:[#allocation8 + $0x8] sm:$0xff]   ;;  %v2550_v9 = vld [vmem:[#allocation8 + $0xd0] sm:$0xff]   ;;  %p2906_p9 = scmp.lt.s32.totalorder %s2043_s30, %s2043_s30 }
  0x92   :  { %v2544_v3 = vld [vmem:[#allocation8 + $0x80] sm:$0xff]   ;;  %2237 = vmatpush3.bf16.msra.mxu0 %v2543_v2  ;;  %v2548_v7 = vld [vmem:[#allocation8 + $0x88] sm:$0xff]   ;;  %v2551_v10 = vld [vmem:[#allocation8 + $0x10] sm:$0xff]  }
  0x93   :  { %2259 = vmatpush3.bf16.msra.mxu1 %v2544_v3  ;;  %2238 = vmatprep.subr.bf16.mxu0 %v2545_v4  ;;  %v2552_v11 = vld [vmem:[#allocation8 + $0x90] sm:$0xff]   ;;  %v2553_v12 = vld [vmem:[#allocation8 + $0x58] sm:$0xff]   ;;  %v2557_v16 = vld [vmem:[#allocation8 + $0x60] sm:$0xff]  }
  0x94   :  { %2260 = vmatprep.subr.bf16.mxu1 %v2546_v5  ;;  %v2554_v13 = vld [vmem:[#allocation8 + $0xd8] sm:$0xff]   ;;  %v2558_v17 = vld [vmem:[#allocation8 + $0xe0] sm:$0xff]   ;;  %v2561_v20 = vld [vmem:[#allocation8 + $0x68] sm:$0xff]  }
  0x95   :  { %v2555_v14 = vld [vmem:[#allocation8 + $0x18] sm:$0xff]   ;;  %v2559_v18 = vld [vmem:[#allocation8 + $0x20] sm:$0xff]   ;;  %v2562_v21 = vld [vmem:[#allocation8 + $0xe8] sm:$0xff]  }
  0x96   :  { %2239 = vmatpush3.bf16.msra.mxu0 %v2547_v6  ;;  %v2556_v15 = vld [vmem:[#allocation8 + $0x98] sm:$0xff]   ;;  %v2560_v19 = vld [vmem:[#allocation8 + $0xa0] sm:$0xff]   ;;  %v2563_v22 = vld [vmem:[#allocation8 + $0x28] sm:$0xff]  }
  0x97   :  { %2261 = vmatpush3.bf16.msra.mxu1 %v2548_v7  ;;  %2240 = vmatprep.subr.bf16.mxu0 %v2549_v8  ;;  %v2564_v23 = vld [vmem:[#allocation8 + $0xa8] sm:$0xff]   ;;  %v2565_v24 = vld [vmem:[#allocation8 + $0x70] sm:$0xff]   ;;  %v2569_v28 = vld [vmem:[#allocation8 + $0x78] sm:$0xff]  }
  0x98   :  { %2262 = vmatprep.subr.bf16.mxu1 %v2550_v9  ;;  %v2566_v25 = vld [vmem:[#allocation8 + $0xf0] sm:$0xff]   ;;  %v2570_v29 = vld [vmem:[#allocation8 + $0xf8] sm:$0xff]   ;;  %v283_v32 = vld [vmem:[#allocation5] sm:$0xff] }
  0x99   :  { %v2567_v26 = vld [vmem:[#allocation8 + $0x30] sm:$0xff]   ;;  %v2571_v30 = vld [vmem:[#allocation8 + $0x38] sm:$0xff]   ;;  %v284_v33 = vld [vmem:[#allocation5 + $0x8] sm:$0xff]  ;;  %v2055_v34 = vcombine.low %v283_v32, %v283_v32  ;;  %v2056_v35 = vcombine.high %v283_v32, %v283_v32 }
  0x9a   :  { %2241 = vmatpush3.bf16.msra.mxu0 %v2551_v10  ;;  %v2568_v27 = vld [vmem:[#allocation8 + $0xb0] sm:$0xff]   ;;  %v2572_v31 = vld [vmem:[#allocation8 + $0xb8] sm:$0xff]   ;;  %v2057_v36 = vcombine.low %v284_v33, %v284_v33  ;;  %v2058_v37 = vcombine.high %v284_v33, %v284_v33  ;;  %v2577_v38 = vld [vmem:[#allocation8 + $0x140] sm:$0xff]  }
  0x9b   :  { %2263 = vmatpush3.bf16.msra.mxu1 %v2552_v11  ;;  %2242 = vmatprep.subr.bf16.mxu0 %v2553_v12  ;;  %v2578_v39 = vld [vmem:[#allocation8 + $0x1c0] sm:$0xff]   ;;  %v2581_v42 = vld [vmem:[#allocation8 + $0x148] sm:$0xff]   ;;  %v2585_v46 = vld [vmem:[#allocation8 + $0x150] sm:$0xff]  }
  0x9c   :  { %2264 = vmatprep.subr.bf16.mxu1 %v2554_v13  ;;  %859 = vmatprep.mubr.bf16.mxu0 %v2056_v35  ;;  %v2579_v40 = vld [vmem:[#allocation8 + $0x100] sm:$0xff]   ;;  %v2582_v43 = vld [vmem:[#allocation8 + $0x1c8] sm:$0xff]   ;;  %v2586_v47 = vld [vmem:[#allocation8 + $0x1d0] sm:$0xff]  }
  0x9d   :  { %899 = vmatprep.mubr.bf16.mxu1 %v2058_v37  ;;  %v2580_v41 = vld [vmem:[#allocation8 + $0x180] sm:$0xff]   ;;  %v2583_v44 = vld [vmem:[#allocation8 + $0x108] sm:$0xff]   ;;  %v2587_v48 = vld [vmem:[#allocation8 + $0x110] sm:$0xff]  }
  0x9e   :  { %2243 = vmatpush3.bf16.msra.mxu0 %v2555_v14  ;;  %v2584_v45 = vld [vmem:[#allocation8 + $0x188] sm:$0xff]   ;;  %v2588_v49 = vld [vmem:[#allocation8 + $0x190] sm:$0xff]   ;;  %v2589_v50 = vld [vmem:[#allocation8 + $0x158] sm:$0xff]  }
  0x9f   :  { %2265 = vmatpush3.bf16.msra.mxu1 %v2556_v15  ;;  %2244 = vmatprep.subr.bf16.mxu0 %v2557_v16  ;;  %v2590_v51 = vld [vmem:[#allocation8 + $0x1d8] sm:$0xff]   ;;  %v2593_v54 = vld [vmem:[#allocation8 + $0x160] sm:$0xff]   ;;  %v2597_v58 = vld [vmem:[#allocation8 + $0x168] sm:$0xff]  }
  0xa0   :  { %2266 = vmatprep.subr.bf16.mxu1 %v2558_v17  ;;  %v2591_v52 = vld [vmem:[#allocation8 + $0x118] sm:$0xff]   ;;  %v2594_v55 = vld [vmem:[#allocation8 + $0x1e0] sm:$0xff]   ;;  %v2598_v59 = vld [vmem:[#allocation8 + $0x1e8] sm:$0xff]  }
  0xa1   :  { %v2592_v53 = vld [vmem:[#allocation8 + $0x198] sm:$0xff]   ;;  %v2595_v56 = vld [vmem:[#allocation8 + $0x120] sm:$0xff]   ;;  %v2599_v60 = vld [vmem:[#allocation8 + $0x128] sm:$0xff]  }
  0xa2   :  { %2245 = vmatpush3.bf16.msra.mxu0 %v2559_v18  ;;  %v2596_v57 = vld [vmem:[#allocation8 + $0x1a0] sm:$0xff]   ;;  %v2600_v61 = vld [vmem:[#allocation8 + $0x1a8] sm:$0xff]   ;;  %v2601_v62 = vld [vmem:[#allocation8 + $0x170] sm:$0xff]  }
  0xa3   :  { %2267 = vmatpush3.bf16.msra.mxu1 %v2560_v19  ;;  %2246 = vmatprep.subr.bf16.mxu0 %v2561_v20  ;;  %v2602_v63 = vld [vmem:[#allocation8 + $0x1f0] sm:$0xff]   ;;  %v2605_v2 = vld [vmem:[#allocation8 + $0x178] sm:$0xff]   ;;  %v2613_v12 = vld [vmem:[#allocation7 + $0x40] sm:$0xff]  }
  0xa4   :  { %2268 = vmatprep.subr.bf16.mxu1 %v2562_v21  ;;  %v2603_v0 = vld [vmem:[#allocation8 + $0x130] sm:$0xff]   ;;  %v2606_v3 = vld [vmem:[#allocation8 + $0x1f8] sm:$0xff]   ;;  %v2614_v13 = vld [vmem:[#allocation7 + $0xc0] sm:$0xff]  }
  0xa5   :  { %v2604_v1 = vld [vmem:[#allocation8 + $0x1b0] sm:$0xff]   ;;  %v2607_v4 = vld [vmem:[#allocation8 + $0x138] sm:$0xff]   ;;  %v2615_v14 = vld [vmem:[#allocation7] sm:$0xff]  }
  0xa6   :  { %2247 = vmatpush3.bf16.msra.mxu0 %v2563_v22  ;;  %v2608_v5 = vld [vmem:[#allocation8 + $0x1b8] sm:$0xff]   ;;  %v285_v6 = vld [vmem:[#allocation5 + $0x10] sm:$0xff]  ;;  %v2616_v15 = vld [vmem:[#allocation7 + $0x80] sm:$0xff]  }
  0xa7   :  { %2269 = vmatpush3.bf16.msra.mxu1 %v2564_v23  ;;  %2248 = vmatprep.subr.bf16.mxu0 %v2565_v24  ;;  %v2059_v7 = vcombine.low %v285_v6, %v285_v6  ;;  %v2060_v8 = vcombine.high %v285_v6, %v285_v6  ;;  %v286_v9 = vld [vmem:[#allocation5 + $0x18] sm:$0xff]  ;;  %v2617_v16 = vld [vmem:[#allocation7 + $0x48] sm:$0xff]   ;;  %v2621_v20 = vld [vmem:[#allocation7 + $0x50] sm:$0xff]  }
  0xa8   :  { %2270 = vmatprep.subr.bf16.mxu1 %v2566_v25  ;;  %v2061_v10 = vcombine.low %v286_v9, %v286_v9  ;;  %v2062_v11 = vcombine.high %v286_v9, %v286_v9  ;;  %v2618_v17 = vld [vmem:[#allocation7 + $0xc8] sm:$0xff]   ;;  %v2622_v21 = vld [vmem:[#allocation7 + $0xd0] sm:$0xff]   ;;  %v2625_v24 = vld [vmem:[#allocation7 + $0x58] sm:$0xff]  }
  0xa9   :  { %v2619_v18 = vld [vmem:[#allocation7 + $0x8] sm:$0xff]   ;;  %v2623_v22 = vld [vmem:[#allocation7 + $0x10] sm:$0xff]   ;;  %v2626_v25 = vld [vmem:[#allocation7 + $0xd8] sm:$0xff]  }
  0xaa   :  { %2249 = vmatpush3.bf16.msra.mxu0 %v2567_v26  ;;  %v2620_v19 = vld [vmem:[#allocation7 + $0x88] sm:$0xff]   ;;  %v2624_v23 = vld [vmem:[#allocation7 + $0x90] sm:$0xff]   ;;  %v2627_v26 = vld [vmem:[#allocation7 + $0x18] sm:$0xff]  }
  0xab   :  { %2271 = vmatpush3.bf16.msra.mxu1 %v2568_v27  ;;  %2250 = vmatprep.subr.bf16.mxu0 %v2569_v28  ;;  %v2628_v27 = vld [vmem:[#allocation7 + $0x98] sm:$0xff]   ;;  %v2629_v28 = vld [vmem:[#allocation7 + $0x60] sm:$0xff]   ;;  %v2633_v32 = vld [vmem:[#allocation7 + $0x68] sm:$0xff]  }
  0xac   :  { %2272 = vmatprep.subr.bf16.mxu1 %v2570_v29  ;;  %v2630_v29 = vld [vmem:[#allocation7 + $0xe0] sm:$0xff]   ;;  %v2634_v33 = vld [vmem:[#allocation7 + $0xe8] sm:$0xff]   ;;  %v2638_v37 = vld [vmem:[#allocation7 + $0xf0] sm:$0xff]  }
  0xad   :  { %v2636_v35 = vld [vmem:[#allocation7 + $0xa8] sm:$0xff]  }
  0xae   :  { %2251 = vmatpush3.bf16.msra.mxu0 %v2571_v30  ;;  %v2631_v30 = vld [vmem:[#allocation7 + $0x20] sm:$0xff]   ;;  %v2669_v6 = vld [vmem:[#allocation7 + $0x168] sm:$0xff]  }
  0xaf   :  { %2273 = vmatpush3.bf16.msra.mxu1 %v2572_v31  ;;  %2280 = vmatprep.subr.bf16.mxu0 %v2577_v38  ;;  %v2632_v31 = vld [vmem:[#allocation7 + $0xa0] sm:$0xff]   ;;  %v2639_v38 = vld [vmem:[#allocation7 + $0x30] sm:$0xff]   ;;  %v2672_v9 = vld [vmem:[#allocation7 + $0x1a8] sm:$0xff]  }
  0xb0   :  { %2302 = vmatprep.subr.bf16.mxu1 %v2578_v39  ;;  %v2640_v39 = vld [vmem:[#allocation7 + $0xb0] sm:$0xff]  }
  0xb1   :  { %860 = vmatmul.mubr.bf16.vlgmr.msra.gmra.mrb[0].mxu0 %v2055_v34  ;;  %v2635_v34 = vld [vmem:[#allocation7 + $0x28] sm:$0xff]  }
  0xb2   :  { %900 = vmatmul.mubr.bf16.vlgmr.msra.gmra.mrb[0].mxu1 %v2057_v36  ;;  %2281 = vmatpush3.bf16.msra.mxu0 %v2579_v40  ;;  %v2637_v36 = vld [vmem:[#allocation7 + $0x70] sm:$0xff]   ;;  %v2641_v40 = vld [vmem:[#allocation7 + $0x78] sm:$0xff]  }
  0xb3   :  { %2303 = vmatpush3.bf16.msra.mxu1 %v2580_v41  ;;  %2282 = vmatprep.subr.bf16.mxu0 %v2581_v42  ;;  %v2642_v41 = vld [vmem:[#allocation7 + $0xf8] sm:$0xff]  }
  0xb4   :  { %2304 = vmatprep.subr.bf16.mxu1 %v2582_v43  ;;  %939 = vmatprep.mubr.bf16.mxu0 %v2060_v8  ;;  %v2643_v42 = vld [vmem:[#allocation7 + $0x38] sm:$0xff]   ;;  %v2671_v8 = vld [vmem:[#allocation7 + $0x128] sm:$0xff]  }
  0xb5   :  { %979 = vmatprep.mubr.bf16.mxu1 %v2062_v11  ;;  %v2644_v43 = vld [vmem:[#allocation7 + $0xb8] sm:$0xff]   ;;  %v2674_v11 = vld [vmem:[#allocation7 + $0x1f0] sm:$0xff]  }
  0xb6   :  { %2283 = vmatpush3.bf16.msra.mxu0 %v2583_v44  ;;  %v151_v44 = vld [vmem:[#allocation2] sm:$0xff] }
  0xb7   :  { %2305 = vmatpush3.bf16.msra.mxu1 %v2584_v45  ;;  %2284 = vmatprep.subr.bf16.mxu0 %v2585_v46  ;;  %v152_v45 = vld [vmem:[#allocation2 + $0x8] sm:$0xff]  ;;  %v2127_v46 = vcombine.low %v151_v44, %v151_v44 }
  0xb8   :  { %2306 = vmatprep.subr.bf16.mxu1 %v2586_v47  ;;  %v2128_v47 = vcombine.high %v151_v44, %v151_v44  ;;  %v2694_v44 = vld [vmem:[#allocation11 + $0x8] sm:$0xff]  }
  0xba   :  { %2285 = vmatpush3.bf16.msra.mxu0 %v2587_v48  ;;  %v2129_v48 = vcombine.low %v152_v45, %v152_v45 }
  0xbb   :  { %2307 = vmatpush3.bf16.msra.mxu1 %v2588_v49  ;;  %2286 = vmatprep.subr.bf16.mxu0 %v2589_v50  ;;  %v2130_v49 = vcombine.high %v152_v45, %v152_v45  ;;  %v2649_v50 = vld [vmem:[#allocation7 + $0x140] sm:$0xff]  }
  0xbc   :  { %2308 = vmatprep.subr.bf16.mxu1 %v2590_v51  ;;  %v2650_v51 = vld [vmem:[#allocation7 + $0x1c0] sm:$0xff]  }
  0xbe   :  { %2287 = vmatpush3.bf16.msra.mxu0 %v2591_v52  ;;  %v2651_v52 = vld [vmem:[#allocation7 + $0x100] sm:$0xff]  }
  0xbf   :  { %2309 = vmatpush3.bf16.msra.mxu1 %v2592_v53  ;;  %2288 = vmatprep.subr.bf16.mxu0 %v2593_v54  ;;  %v2652_v53 = vld [vmem:[#allocation7 + $0x180] sm:$0xff]   ;;  %v2653_v54 = vld [vmem:[#allocation7 + $0x148] sm:$0xff]  }
  0xc0   :  { %2310 = vmatprep.subr.bf16.mxu1 %v2594_v55  ;;  %v2654_v55 = vld [vmem:[#allocation7 + $0x1c8] sm:$0xff]  }
  0xc2   :  { %2289 = vmatpush3.bf16.msra.mxu0 %v2595_v56  ;;  %v2655_v56 = vld [vmem:[#allocation7 + $0x108] sm:$0xff]  }
  0xc3   :  { %2311 = vmatpush3.bf16.msra.mxu1 %v2596_v57  ;;  %2290 = vmatprep.subr.bf16.mxu0 %v2597_v58  ;;  %v2656_v57 = vld [vmem:[#allocation7 + $0x188] sm:$0xff]   ;;  %v2657_v58 = vld [vmem:[#allocation7 + $0x150] sm:$0xff]  }
  0xc4   :  { %2312 = vmatprep.subr.bf16.mxu1 %v2598_v59  ;;  %v2658_v59 = vld [vmem:[#allocation7 + $0x1d0] sm:$0xff]  }
  0xc6   :  { %2291 = vmatpush3.bf16.msra.mxu0 %v2599_v60  ;;  %v2659_v60 = vld [vmem:[#allocation7 + $0x110] sm:$0xff]  }
  0xc7   :  { %2313 = vmatpush3.bf16.msra.mxu1 %v2600_v61  ;;  %2292 = vmatprep.subr.bf16.mxu0 %v2601_v62  ;;  %v2660_v61 = vld [vmem:[#allocation7 + $0x190] sm:$0xff]   ;;  %v2661_v62 = vld [vmem:[#allocation7 + $0x158] sm:$0xff]  }
  0xc8   :  { %2314 = vmatprep.subr.bf16.mxu1 %v2602_v63  ;;  %v2662_v63 = vld [vmem:[#allocation7 + $0x1d8] sm:$0xff]  }
  0xca   :  { %2293 = vmatpush3.bf16.msra.mxu0 %v2603_v0  ;;  %v2663_v0 = vld [vmem:[#allocation7 + $0x118] sm:$0xff]  }
  0xcb   :  { %2315 = vmatpush3.bf16.msra.mxu1 %v2604_v1  ;;  %2294 = vmatprep.subr.bf16.mxu0 %v2605_v2  ;;  %v2664_v1 = vld [vmem:[#allocation7 + $0x198] sm:$0xff]   ;;  %v2665_v2 = vld [vmem:[#allocation7 + $0x160] sm:$0xff]  }
  0xcc   :  { %2316 = vmatprep.subr.bf16.mxu1 %v2606_v3  ;;  %v2666_v3 = vld [vmem:[#allocation7 + $0x1e0] sm:$0xff]  }
  0xce   :  { %2295 = vmatpush3.bf16.msra.mxu0 %v2607_v4  ;;  %v2667_v4 = vld [vmem:[#allocation7 + $0x120] sm:$0xff]  }
  0xcf   :  { %2317 = vmatpush3.bf16.msra.mxu1 %v2608_v5  ;;  %2324 = vmatprep.subr.bf16.mxu0 %v2613_v12  ;;  %v2668_v5 = vld [vmem:[#allocation7 + $0x1a0] sm:$0xff]   ;;  %v2675_v12 = vld [vmem:[#allocation7 + $0x130] sm:$0xff]  }
  0xd0   :  { %2346 = vmatprep.subr.bf16.mxu1 %v2614_v13  ;;  %v2676_v13 = vld [vmem:[#allocation7 + $0x1b0] sm:$0xff]  }
  0xd1   :  { %940 = vmatmul.mubr.bf16.vlgmr.msra.gmra.mrb[4].mxu0 %v2059_v7  ;;  %v2670_v7 = vld [vmem:[#allocation7 + $0x1e8] sm:$0xff]  }
  0xd2   :  { %980 = vmatmul.mubr.bf16.vlgmr.msra.gmra.mrb[4].mxu1 %v2061_v10  ;;  %2325 = vmatpush3.bf16.msra.mxu0 %v2615_v14  ;;  %v2673_v10 = vld [vmem:[#allocation7 + $0x170] sm:$0xff]   ;;  %v2677_v14 = vld [vmem:[#allocation7 + $0x178] sm:$0xff]  }
  0xd3   :  { %2347 = vmatpush3.bf16.msra.mxu1 %v2616_v15  ;;  %2326 = vmatprep.subr.bf16.mxu0 %v2617_v16  ;;  %v2678_v15 = vld [vmem:[#allocation7 + $0x1f8] sm:$0xff]  }
  0xd4   :  { %2348 = vmatprep.subr.bf16.mxu1 %v2618_v17  ;;  %1431 = vmatprep.mubr.bf16.mxu0 %v2128_v47  ;;  %v2679_v16 = vld [vmem:[#allocation7 + $0x138] sm:$0xff]  }
  0xd5   :  { %1471 = vmatprep.mubr.bf16.mxu1 %v2130_v49  ;;  %v2680_v17 = vld [vmem:[#allocation7 + $0x1b8] sm:$0xff]  }
  0xd6   :  { %2327 = vmatpush3.bf16.msra.mxu0 %v2619_v18  ;;  %v153_v18 = vld [vmem:[#allocation2 + $0x10] sm:$0xff] }
  0xd7   :  { %2349 = vmatpush3.bf16.msra.mxu1 %v2620_v19  ;;  %2328 = vmatprep.subr.bf16.mxu0 %v2621_v20  ;;  %v154_v19 = vld [vmem:[#allocation2 + $0x18] sm:$0xff]  ;;  %v2131_v20 = vcombine.low %v153_v18, %v153_v18 }
  0xd8   :  { %2350 = vmatprep.subr.bf16.mxu1 %v2622_v21  ;;  %v2132_v21 = vcombine.high %v153_v18, %v153_v18 }
  0xda   :  { %2329 = vmatpush3.bf16.msra.mxu0 %v2623_v22  ;;  %v2133_v22 = vcombine.low %v154_v19, %v154_v19 }
  0xdb   :  { %2351 = vmatpush3.bf16.msra.mxu1 %v2624_v23  ;;  %2330 = vmatprep.subr.bf16.mxu0 %v2625_v24  ;;  %v2134_v23 = vcombine.high %v154_v19, %v154_v19  ;;  %v2945_v24 = vmov 0.0  }
  0xdc   :  { %2352 = vmatprep.subr.bf16.mxu1 %v2626_v25  ;;  %v2685_v25 = vld [vmem:[#allocation10] sm:$0xff]  }
  0xde   :  { %2331 = vmatpush3.bf16.msra.mxu0 %v2627_v26  ;;  %v2686_v26 = vld [vmem:[#allocation10 + $0x8] sm:$0xff]  }
  0xdf   :  { %2353 = vmatpush3.bf16.msra.mxu1 %v2628_v27  ;;  %2332 = vmatprep.subr.bf16.mxu0 %v2629_v28  ;;  %v2687_v27 = vld [vmem:[#allocation10 + $0x10] sm:$0xff]   ;;  %v2688_v28 = vld [vmem:[#allocation10 + $0x18] sm:$0xff]  }
  0xe0   :  { %2354 = vmatprep.subr.bf16.mxu1 %v2630_v29  ;;  %v2689_v29 = vld [vmem:[#allocation10 + $0x20] sm:$0xff]  }
  0xe2   :  { %2333 = vmatpush3.bf16.msra.mxu0 %v2631_v30  ;;  %v2690_v30 = vld [vmem:[#allocation10 + $0x28] sm:$0xff]  }
  0xe3   :  { %2355 = vmatpush3.bf16.msra.mxu1 %v2632_v31  ;;  %2334 = vmatprep.subr.bf16.mxu0 %v2633_v32  ;;  %v2691_v31 = vld [vmem:[#allocation10 + $0x30] sm:$0xff]   ;;  %v2692_v32 = vld [vmem:[#allocation10 + $0x38] sm:$0xff]  }
  0xe4   :  { %2356 = vmatprep.subr.bf16.mxu1 %v2634_v33 }
  0xe6   :  { %2335 = vmatpush3.bf16.msra.mxu0 %v2635_v34 }
  0xe7   :  { %2357 = vmatpush3.bf16.msra.mxu1 %v2636_v35  ;;  %2336 = vmatprep.subr.bf16.mxu0 %v2637_v36 }
  0xe8   :  { %2358 = vmatprep.subr.bf16.mxu1 %v2638_v37  ;;  %v2693_v37 = vld [vmem:[#allocation11] sm:$0xff]  }
  0xea   :  { %2337 = vmatpush3.bf16.msra.mxu0 %v2639_v38 }
  0xeb   :  { %2359 = vmatpush3.bf16.msra.mxu1 %v2640_v39  ;;  %2338 = vmatprep.subr.bf16.mxu0 %v2641_v40 }
  0xec   :  { %2360 = vmatprep.subr.bf16.mxu1 %v2642_v41 }
  0xee   :  { %2339 = vmatpush3.bf16.msra.mxu0 %v2643_v42 }
  0xef   :  { %2361 = vmatpush3.bf16.msra.mxu1 %v2644_v43  ;;  %2368 = vmatprep.subr.bf16.mxu0 %v2649_v50 }
  0xf0   :  { %2390 = vmatprep.subr.bf16.mxu1 %v2650_v51 }
  0xf1   :  { %1432 = vmatmul.mubr.bf16.vlgmr.msra.gmra.mrb[8].mxu0 %v2127_v46 }
  0xf2   :  { %1472 = vmatmul.mubr.bf16.vlgmr.msra.gmra.mrb[8].mxu1 %v2129_v48  ;;  %2369 = vmatpush3.bf16.msra.mxu0 %v2651_v52 }
  0xf3   :  { %2391 = vmatpush3.bf16.msra.mxu1 %v2652_v53  ;;  %2370 = vmatprep.subr.bf16.mxu0 %v2653_v54 }
  0xf4   :  { %2392 = vmatprep.subr.bf16.mxu1 %v2654_v55  ;;  %1511 = vmatprep.mubr.bf16.mxu0 %v2132_v21 }
  0xf5   :  { %1551 = vmatprep.mubr.bf16.mxu1 %v2134_v23 }
  0xf6   :  { %2371 = vmatpush3.bf16.msra.mxu0 %v2655_v56 }
  0xf7   :  { %2393 = vmatpush3.bf16.msra.mxu1 %v2656_v57  ;;  %2372 = vmatprep.subr.bf16.mxu0 %v2657_v58 }
  0xf8   :  { %2394 = vmatprep.subr.bf16.mxu1 %v2658_v59 }
  0xfa   :  { %2373 = vmatpush3.bf16.msra.mxu0 %v2659_v60 }
  0xfb   :  { %2395 = vmatpush3.bf16.msra.mxu1 %v2660_v61  ;;  %2374 = vmatprep.subr.bf16.mxu0 %v2661_v62 }
  0xfc   :  { %2396 = vmatprep.subr.bf16.mxu1 %v2662_v63 }
  0xfe   :  { %2375 = vmatpush3.bf16.msra.mxu0 %v2663_v0 }
  0xff   :  { %2397 = vmatpush3.bf16.msra.mxu1 %v2664_v1  ;;  %2376 = vmatprep.subr.bf16.mxu0 %v2665_v2 }
 0x100   :  { %2398 = vmatprep.subr.bf16.mxu1 %v2666_v3 }
 0x102   :  { %2377 = vmatpush3.bf16.msra.mxu0 %v2667_v4 }
 0x103   :  { %2399 = vmatpush3.bf16.msra.mxu1 %v2668_v5  ;;  %2378 = vmatprep.subr.bf16.mxu0 %v2669_v6 }
 0x104   :  { %2400 = vmatprep.subr.bf16.mxu1 %v2670_v7 }
 0x106   :  { %2379 = vmatpush3.bf16.msra.mxu0 %v2671_v8 }
 0x107   :  { %2401 = vmatpush3.bf16.msra.mxu1 %v2672_v9  ;;  %2380 = vmatprep.subr.bf16.mxu0 %v2673_v10 }
 0x108   :  { %2402 = vmatprep.subr.bf16.mxu1 %v2674_v11 }
 0x10a   :  { %2381 = vmatpush3.bf16.msra.mxu0 %v2675_v12 }
 0x10b   :  { %2403 = vmatpush3.bf16.msra.mxu1 %v2676_v13  ;;  %2382 = vmatprep.subr.bf16.mxu0 %v2677_v14 }
 0x10c   :  { %2404 = vmatprep.subr.bf16.mxu1 %v2678_v15 }
 0x10e   :  { %2383 = vmatpush3.bf16.msra.mxu0 %v2679_v16 }
 0x10f   :  { %2405 = vmatpush3.bf16.msra.mxu1 %v2680_v17  ;;  %2448 = vmatprep.subr.bf16.mxu0 %v2945_v24  ;;  %v2199_v17 = vld [vmem:[%s3203_s4] ss:$0 sm:$0xff] }
 0x110   :  { %2468 = vmatprep.subr.bf16.mxu1 %v2945_v24 }
 0x111   :  { %1512 = vmatmul.mubr.bf16.vlgmr.msra.gmra.mrb[12].mxu0 %v2131_v20 }
 0x112   :  { %1552 = vmatmul.mubr.bf16.vlgmr.msra.gmra.mrb[12].mxu1 %v2133_v22  ;;  %2449 = vmatpush3.bf16.msra.mxu0 %v2685_v25 }
 0x113   :  { %2450 = vmatprep.subr.bf16.mxu0 %v2945_v24  ;;  %2464 = vmatprep.mubr.msk.bf16.mxu0 %vm2946_vm0, %v2945_v24 }
 0x114   :  { %2484 = vmatprep.mubr.msk.bf16.mxu1 %vm2946_vm0, %v2945_v24  ;;  %2469 = vmatpush3.bf16.msra.mxu1 %v2693_v37 }
 0x115   :  { %2470 = vmatprep.subr.bf16.mxu1 %v2945_v24 }
 0x116   :  { %2451 = vmatpush3.bf16.msra.mxu0 %v2686_v26 }
 0x117   :  { %2452 = vmatprep.subr.bf16.mxu0 %v2945_v24 }
 0x118   :  { %2471 = vmatpush3.bf16.msra.mxu1 %v2694_v44 }
 0x119   :  { %2472 = vmatprep.subr.bf16.mxu1 %v2945_v24 }
 0x11a   :  { %2453 = vmatpush3.bf16.msra.mxu0 %v2687_v27  ;;  %v2695_v27 = vld [vmem:[#allocation11 + $0x10] sm:$0xff]  }
 0x11b   :  { %2454 = vmatprep.subr.bf16.mxu0 %v2945_v24 }
 0x11c   :  { %2473 = vmatpush3.bf16.msra.mxu1 %v2695_v27 }
 0x11d   :  { %2474 = vmatprep.subr.bf16.mxu1 %v2945_v24 }
 0x11e   :  { %2455 = vmatpush3.bf16.msra.mxu0 %v2688_v28  ;;  %v2696_v28 = vld [vmem:[#allocation11 + $0x18] sm:$0xff]  }
 0x11f   :  { %2456 = vmatprep.subr.bf16.mxu0 %v2945_v24 }
 0x120   :  { %2475 = vmatpush3.bf16.msra.mxu1 %v2696_v28 }
 0x121   :  { %2476 = vmatprep.subr.bf16.mxu1 %v2945_v24 }
 0x122   :  { %2457 = vmatpush3.bf16.msra.mxu0 %v2689_v29  ;;  %v2697_v29 = vld [vmem:[#allocation11 + $0x20] sm:$0xff]  }
 0x123   :  { %2458 = vmatprep.subr.bf16.mxu0 %v2945_v24 }
 0x124   :  { %2477 = vmatpush3.bf16.msra.mxu1 %v2697_v29 }
 0x125   :  { %2478 = vmatprep.subr.bf16.mxu1 %v2945_v24 }
 0x126   :  { %2459 = vmatpush3.bf16.msra.mxu0 %v2690_v30  ;;  %v2698_v30 = vld [vmem:[#allocation11 + $0x28] sm:$0xff]  }
 0x127   :  { %2460 = vmatprep.subr.bf16.mxu0 %v2945_v24 }
 0x128   :  { %2479 = vmatpush3.bf16.msra.mxu1 %v2698_v30 }
 0x129   :  { %2480 = vmatprep.subr.bf16.mxu1 %v2945_v24 }
 0x12a   :  { %2461 = vmatpush3.bf16.msra.mxu0 %v2691_v31  ;;  %v2699_v31 = vld [vmem:[#allocation11 + $0x30] sm:$0xff]  }
 0x12b   :  { %2462 = vmatprep.subr.bf16.mxu0 %v2945_v24 }
 0x12c   :  { %2481 = vmatpush3.bf16.msra.mxu1 %v2699_v31 }
 0x12d   :  { %2482 = vmatprep.subr.bf16.mxu1 %v2945_v24 }
 0x12e   :  { %2463 = vmatpush3.bf16.msra.mxu0 %v2692_v32  ;;  %v2700_v32 = vld [vmem:[#allocation11 + $0x38] sm:$0xff]  }
 0x12f   :  { %2488 = vmatprep.subr.bf16.mxu0 %v2945_v24 }
 0x130   :  { %2483 = vmatpush3.bf16.msra.mxu1 %v2700_v32 }
 0x131   :  { %2508 = vmatprep.subr.bf16.mxu1 %v2945_v24 }
 0x184   :  { %v2252_v33 = vpop.f32.mrb[0].mxu0 }
 0x185   :  { %v2274_v34 = vpop.f32.mrb[0].mxu1  ;;  %v2253_v35 = vpop.f32.mrb[1].mxu0 }
 0x186   :  { %v2275_v36 = vpop.f32.mrb[1].mxu1  ;;  %v2254_v38 = vadd.f32 %v2253_v35, %v2252_v33  ;;  %v2255_v40 = vpop.f32.mrb[2].mxu0  ;;  %v2701_v33 = vld [vmem:[#allocation13] sm:$0xff]  }
 0x187   :  { %v2276_v39 = vadd.f32 %v2275_v36, %v2274_v34  ;;  %v2277_v41 = vpop.f32.mrb[2].mxu1  ;;  %v2256_v42 = vpop.f32.mrb[3].mxu0  ;;  %v2702_v34 = vld [vmem:[#allocation13 + $0x8] sm:$0xff]   ;;  %v2200_v35 = vld [vmem:[%s3205_s6] ss:$0 sm:$0xff] }
 0x188   :  { %v2278_v43 = vpop.f32.mrb[3].mxu1 }
 0x189   :  { %v902_v45 = vadd.f32 %v2276_v39, %v2254_v38 }
 0x1a4   :  { %v2296_v46 = vpop.f32.mrb[4].mxu0 }
 0x1a5   :  { %v2318_v47 = vpop.f32.mrb[4].mxu1  ;;  %v2297_v48 = vpop.f32.mrb[5].mxu0 }
 0x1a6   :  { %v2319_v49 = vpop.f32.mrb[5].mxu1  ;;  %v2298_v50 = vadd.f32 %v2297_v48, %v2296_v46  ;;  %v2299_v52 = vpop.f32.mrb[6].mxu0  ;;  %v2704_v48 = vld [vmem:[#allocation13 + $0x18] sm:$0xff]  }
 0x1a7   :  { %v2320_v51 = vadd.f32 %v2319_v49, %v2318_v47  ;;  %v2321_v53 = vpop.f32.mrb[6].mxu1  ;;  %v2300_v54 = vpop.f32.mrb[7].mxu0  ;;  %v2703_v47 = vld [vmem:[#allocation13 + $0x10] sm:$0xff]   ;;  %v2705_v49 = vld [vmem:[#allocation13 + $0x20] sm:$0xff]   ;;  %v2708_v52 = vld [vmem:[#allocation13 + $0x38] sm:$0xff]  }
 0x1a8   :  { %v2322_v55 = vpop.f32.mrb[7].mxu1  ;;  %v942_v56 = vadd.f32 %v2298_v50, %v902_v45  ;;  %v2706_v50 = vld [vmem:[#allocation13 + $0x28] sm:$0xff]   ;;  %v2709_v53 = vld [vmem:[#allocation14] sm:$0xff]  }
 0x1a9   :  { %v2710_v54 = vld [vmem:[#allocation14 + $0x8] sm:$0xff]   ;;  %v2209_v55 = vld [vmem:[%s3207_s8] ss:$0 sm:$0xff] }
 0x1aa   :  { %v982_v57 = vadd.f32 %v2320_v51, %v942_v56  ;;  %v2707_v51 = vld [vmem:[#allocation13 + $0x30] sm:$0xff]  }
 0x1c4   :  { %v2340_v58 = vpop.f32.mrb[8].mxu0 }
 0x1c5   :  { %v2362_v59 = vpop.f32.mrb[8].mxu1  ;;  %v2341_v60 = vpop.f32.mrb[9].mxu0 }
 0x1c6   :  { %v2342_v61 = vadd.f32 %v2341_v60, %v2340_v58  ;;  %v2363_v62 = vpop.f32.mrb[9].mxu1  ;;  %v2343_v63 = vpop.f32.mrb[10].mxu0 }
 0x1c7   :  { %v2364_v0 = vadd.f32 %v2363_v62, %v2362_v59  ;;  %v2365_v1 = vpop.f32.mrb[10].mxu1  ;;  %v2344_v2 = vpop.f32.mrb[11].mxu0 }
 0x1c8   :  { %v1434_v3 = vadd.f32 %v2342_v61, %v982_v57  ;;  %v2366_v4 = vpop.f32.mrb[11].mxu1 }
 0x1c9   :  { %v2712_v4 = vld [vmem:[#allocation14 + $0x18] sm:$0xff]  }
 0x1ca   :  { %v1474_v5 = vadd.f32 %v2364_v0, %v1434_v3  ;;  %v2711_v3 = vld [vmem:[#allocation14 + $0x10] sm:$0xff]  }
 0x1e4   :  { %v2384_v6 = vpop.f32.mrb[12].mxu0 }
 0x1e5   :  { %v2406_v7 = vpop.f32.mrb[12].mxu1  ;;  %v2385_v8 = vpop.f32.mrb[13].mxu0 }
 0x1e6   :  { %v2386_v9 = vadd.f32 %v2385_v8, %v2384_v6  ;;  %v2407_v10 = vpop.f32.mrb[13].mxu1  ;;  %v2387_v11 = vpop.f32.mrb[14].mxu0  ;;  %v2714_v6 = vld [vmem:[#allocation14 + $0x28] sm:$0xff]   ;;  %v2716_v8 = vld [vmem:[#allocation14 + $0x38] sm:$0xff]  }
 0x1e7   :  { %v2408_v12 = vadd.f32 %v2407_v10, %v2406_v7  ;;  %v2409_v13 = vpop.f32.mrb[14].mxu1  ;;  %v2388_v14 = vpop.f32.mrb[15].mxu0  ;;  %v2715_v7 = vld [vmem:[#allocation14 + $0x30] sm:$0xff]  }
 0x1e8   :  { %v1514_v15 = vadd.f32 %v2386_v9, %v1474_v5  ;;  %v2410_v16 = vpop.f32.mrb[15].mxu1  ;;  %v2713_v5 = vld [vmem:[#allocation14 + $0x20] sm:$0xff]  }
 0x1e9   :  { %v2218_v9 = vld [vmem:[%s3209_s10] ss:$0 sm:$0xff]  ;;  %s2901_s10 = scalar_lea.vmem %s2043_s30, 128 }
 0x1ea   :  { %v1554_v18 = vadd.f32 %v2408_v12, %v1514_v15  ;;  %p2902_p8 = scmp.ne.s32.totalorder %s2043_s30, %s2901_s10  ;;  %p2907_p10 = scmp.lt.s32.totalorder %s2901_s10, %s2901_s10 }
 0x1ec   :  { %v1566_v19 = vadd.f32 %v2199_v17, %v1554_v18  ;;  %p2908_p11 = por %p2907_p10, %p2906_p9 }
 0x1ee   :  { %v1567_v20 = vmul.f32 0.5, %v1566_v19  ;;  %p2909_p12 = pnand %p2908_p11, %p2902_p8 }
 0x1f0   :  { %2717 = vtanh.f32 %v1567_v20 }
 0x1fa   :  { %v2718_v21 = vpop.eup %2717 }
 0x1fb   :  { %v1569_v22 = vadd.f32 1.0, %v2718_v21 }
 0x1fd   :  { %v1570_v23 = vmul.f32 0.5, %v1569_v22 }
 0x1ff   :  { %v1571_v25 = vmul.f32 %v1570_v23, %v1566_v19 }
 0x201   :  { %v1572_v26 = vpack.c.bf16 %v1571_v25, %v1571_v25 }
 0x203   :  { %2465 = vmatmul.mubr.bf16.vlgmr.msra.gmra.mrb[16].mxu0 %v1572_v26 }
 0x204   :  { %2504 = vmatprep.mubr.msk.bf16.mxu0 %vm2946_vm0, %v2945_v24  ;;  %2489 = vmatpush3.bf16.msra.mxu0 %v2701_v33 }
 0x205   :  { %2490 = vmatprep.subr.bf16.mxu0 %v2945_v24 }
 0x208   :  { %2491 = vmatpush3.bf16.msra.mxu0 %v2702_v34 }
 0x209   :  { %2492 = vmatprep.subr.bf16.mxu0 %v2945_v24 }
 0x20c   :  { %2493 = vmatpush3.bf16.msra.mxu0 %v2703_v47 }
 0x20d   :  { %2494 = vmatprep.subr.bf16.mxu0 %v2945_v24 }
 0x210   :  { %2495 = vmatpush3.bf16.msra.mxu0 %v2704_v48 }
 0x211   :  { %2496 = vmatprep.subr.bf16.mxu0 %v2945_v24 }
 0x214   :  { %2497 = vmatpush3.bf16.msra.mxu0 %v2705_v49 }
 0x215   :  { %2498 = vmatprep.subr.bf16.mxu0 %v2945_v24 }
 0x218   :  { %2499 = vmatpush3.bf16.msra.mxu0 %v2706_v50 }
 0x219   :  { %2500 = vmatprep.subr.bf16.mxu0 %v2945_v24 }
 0x21c   :  { %2501 = vmatpush3.bf16.msra.mxu0 %v2707_v51 }
 0x21d   :  { %2502 = vmatprep.subr.bf16.mxu0 %v2945_v24 }
 0x220   :  { %2503 = vmatpush3.bf16.msra.mxu0 %v2708_v52 }
 0x2d6   :  { %v1678_v36 = vpop.f32.mrb[16].mxu0 }
 0x2d7   :  { %v1679_v37 = vadd.f32 %v2200_v35, %v1678_v36  ;;  %v2466_v38 = vpop.f32.mrb[17].mxu0 }
 0x2d8   :  { %v1681_v39 = vpop.f32.mrb[18].mxu0 }
 0x2d9   :  { %v1684_v40 = vmul.f32 0.5, %v1679_v37  ;;  %v2467_v41 = vpop.f32.mrb[19].mxu0 }
 0x2db   :  { %2719 = vtanh.f32 %v1684_v40 }
 0x2e5   :  { %v2720_v42 = vpop.eup %2719 }
 0x2e6   :  { %v1686_v43 = vadd.f32 1.0, %v2720_v42 }
 0x2e8   :  { %v1687_v44 = vmul.f32 0.5, %v1686_v43 }
 0x2ea   :  { %v1688_v45 = vmul.f32 %v1687_v44, %v1679_v37 }
 0x2ec   :  { %v1689_v46 = vpack.c.bf16 %v1688_v45, %v1688_v45 }
 0x2ee   :  { %2485 = vmatmul.mubr.bf16.vlgmr.msra.gmra.mrb[16].mxu1 %v1689_v46 }
 0x2ef   :  { %2524 = vmatprep.mubr.msk.bf16.mxu1 %vm2946_vm0, %v2945_v24  ;;  %2509 = vmatpush3.bf16.msra.mxu1 %v2709_v53 }
 0x2f0   :  { %2510 = vmatprep.subr.bf16.mxu1 %v2945_v24 }
 0x2f3   :  { %2511 = vmatpush3.bf16.msra.mxu1 %v2710_v54 }
 0x2f4   :  { %2512 = vmatprep.subr.bf16.mxu1 %v2945_v24 }
 0x2f7   :  { %2513 = vmatpush3.bf16.msra.mxu1 %v2711_v3 }
 0x2f8   :  { %2514 = vmatprep.subr.bf16.mxu1 %v2945_v24 }
 0x2fb   :  { %2515 = vmatpush3.bf16.msra.mxu1 %v2712_v4 }
 0x2fc   :  { %2516 = vmatprep.subr.bf16.mxu1 %v2945_v24 }
 0x2ff   :  { %2517 = vmatpush3.bf16.msra.mxu1 %v2713_v5 }
 0x300   :  { %2518 = vmatprep.subr.bf16.mxu1 %v2945_v24 }
 0x303   :  { %2519 = vmatpush3.bf16.msra.mxu1 %v2714_v6 }
 0x304   :  { %2520 = vmatprep.subr.bf16.mxu1 %v2945_v24 }
 0x307   :  { %2521 = vmatpush3.bf16.msra.mxu1 %v2715_v7 }
 0x308   :  { %2522 = vmatprep.subr.bf16.mxu1 %v2945_v24  ;;  %v2227_v24 = vld [vmem:[%s3211_s12] ss:$0 sm:$0xff] }
 0x30b   :  { %2523 = vmatpush3.bf16.msra.mxu1 %v2716_v8 }
 0x3c1   :  { %v1795_v56 = vpop.f32.mrb[16].mxu1 }
 0x3c2   :  { %v1796_v57 = vadd.f32 %v2209_v55, %v1795_v56  ;;  %v2486_v58 = vpop.f32.mrb[17].mxu1 }
 0x3c3   :  { %v1798_v59 = vpop.f32.mrb[18].mxu1 }
 0x3c4   :  { %v1801_v60 = vmul.f32 0.5, %v1796_v57  ;;  %v2487_v61 = vpop.f32.mrb[19].mxu1 }
 0x3c6   :  { %2721 = vtanh.f32 %v1801_v60 }
 0x3d0   :  { %v2722_v62 = vpop.eup %2721 }
 0x3d1   :  { %v1803_v63 = vadd.f32 1.0, %v2722_v62 }
 0x3d3   :  { %v1804_v0 = vmul.f32 0.5, %v1803_v63 }
 0x3d5   :  { %v1805_v1 = vmul.f32 %v1804_v0, %v1796_v57 }
 0x3d7   :  { %v1806_v2 = vpack.c.bf16 %v1805_v1, %v1805_v1 }
 0x3d9   :  { %2505 = vmatmul.mubr.bf16.vlgmr.msra.gmra.mrb[20].mxu0 %v1806_v2 }
 0x4ac   :  { %v1912_v10 = vpop.f32.mrb[20].mxu0 }
 0x4ad   :  { %v1913_v11 = vadd.f32 %v2218_v9, %v1912_v10  ;;  %v2506_v12 = vpop.f32.mrb[21].mxu0 }
 0x4ae   :  { %v1915_v13 = vpop.f32.mrb[22].mxu0 }
 0x4af   :  { %v1918_v14 = vmul.f32 0.5, %v1913_v11  ;;  %v2507_v15 = vpop.f32.mrb[23].mxu0 }
 0x4b1   :  { %2723 = vtanh.f32 %v1918_v14 }
 0x4bb   :  { %v2724_v16 = vpop.eup %2723 }
 0x4bc   :  { %v1920_v17 = vadd.f32 1.0, %v2724_v16 }
 0x4be   :  { %v1921_v18 = vmul.f32 0.5, %v1920_v17 }
 0x4c0   :  { %v1922_v19 = vmul.f32 %v1921_v18, %v1913_v11 }
 0x4c2   :  { %v1923_v20 = vpack.c.bf16 %v1922_v19, %v1922_v19 }
 0x4c4   :  { %2525 = vmatmul.mubr.bf16.vlgmr.msra.gmra.mrb[20].mxu1 %v1923_v20 }
 0x597   :  { %v2029_v21 = vpop.f32.mrb[20].mxu1 }
 0x598   :  { %v2030_v22 = vadd.f32 %v2227_v24, %v2029_v21  ;;  %v2526_v23 = vpop.f32.mrb[21].mxu1 }
 0x599   :  { %v2032_v25 = vpop.f32.mrb[22].mxu1 }
 0x59a   :  { %2035 = vst [vmem:[#allocation16] sm:$0xff] %v2030_v22  ;;  %v2527_v26 = vpop.f32.mrb[23].mxu1 }
 0x59b   :  { %2912 = shalt.err (!%p2909_p12)
}
 0x59c   :  { %s2913_s12 = scalar_lea.hbm %s3212_s13, 128 }
 0x59d   :  { %p2914_p13 = scmp.ne.s32.totalorder %s3212_s13, %s2913_s12  ;;  %p2917_p0 = scmp.lt.u32.totalorder %s2913_s12, %s3212_s13 }
 0x59f   :  { %p2919_p1 = pnand %p2917_p0, %p2914_p13 }
 0x5a1   :  { %2922 = shalt.err (!%p2919_p1)
}
 0x5a2   :  { %2045 = dma.vmem_to_hbm [thread:$0]  %s2043_s30, 128, %s3212_s13, [#allocation4]  }
 0x5a3   :  { %2933 = dma.done.wait [#allocation4], 128  }
 0x5a4   :  { %2934 = vsyncadd [#allocation4], 4294967168 }
 0x5a5   :  { %2049 = vsyncpa [#allocation3], 1 }
 0x5a6   :  { %2050 = vsyncpa [#allocation6], 1 }
 0x5a7   :  { %2051 = vsyncpa [#allocation9], 1 }
 0x5a8   :  { %2052 = vsyncpa [#allocation12], 1 }
 0x5a9   :  { %2053 = vsyncpa [#allocation15], 1 }
 0x5aa   :  { %2054 = vsyncpa [#allocation4], 1 }

</bundles_post_ra>
